<compile_context>
chip_gen: v7x
topology: tpu7x:2x2x1
jax: 0.10.0
libtpu: 0.0.40
codegen_flags: <defaults>
</compile_context>

<pallas_src>
import functools

import jax
import jax.numpy as jnp
from jax.experimental import pallas as pl
from jax.experimental.pallas import tpu as pltpu

EPS = 1e-5  # nn.LayerNorm default

# Compat shim: older JAX releases named this TPUCompilerParams.
_CompilerParams = getattr(pltpu, "CompilerParams", None) or getattr(
    pltpu, "TPUCompilerParams")


def _round_up(x, m):
    return (x + m - 1) // m * m


def _sublane(itemsize):
    return 8 if itemsize >= 4 else (16 if itemsize == 2 else 32)


def _vmem_budget():
    """Generation-aware (budget_bytes, vmem_limit_bytes)."""
    physical = 64 * 1024 * 1024  # conservative fallback = v7x per-TC VMEM
    try:
        info = pltpu.get_tpu_info()
        cap = int(getattr(info, "vmem_capacity_bytes"))
        if cap >= 32 * 1024 * 1024:
            physical = cap
    except Exception:
        pass
    # v5e/v6e (128 MiB physical): limit ~96 MiB, budget ~72 MiB.
    # v7x (64 MiB per TC):        limit ~48 MiB, budget ~36 MiB.
    limit = min(physical * 3 // 4, 96 * 1024 * 1024)
    budget = limit * 3 // 4
    return int(budget), int(limit)


def _plan(rows, d_pad, itemsize):
    """Choose (mode, row_tile, n_tile, vmem_limit)."""
    budget, limit = _vmem_budget()
    sub = _sublane(itemsize)
    small = 8 * 4 * d_pad          # gamma / beta / bias buffers (generous)
    f32_tmp = 12 * d_pad           # ~3 live f32 (row, Dp) LayerNorm temporaries

    # Resident-W path: W fetched once (constant index_map), no N grid axis.
    w_res = 2 * d_pad * d_pad * itemsize            # double-buffer worst case
    per_row_res = 4 * d_pad * itemsize + f32_tmp    # x + out (double-buffered)
    min_rows = min(256, _round_up(rows, sub))
    if w_res + small + min_rows * per_row_res <= budget:
        tm = (budget - w_res - small) // per_row_res
        tm = min(max(sub, (tm // sub) * sub), 1024, _round_up(rows, sub))
        return "resident", int(tm), 0, limit

    # N-tiled fallback for large D: (Dp, tn) weight tiles stream over axis 1.
    tn = 256 if d_pad % 256 == 0 else 128
    fixed = 2 * d_pad * tn * itemsize + small
    per_row = (3 * d_pad + 2 * tn) * itemsize + f32_tmp
    tm = max(budget - fixed, per_row) // per_row
    tm = min(max(sub, (tm // sub) * sub), 1024, _round_up(rows, sub))
    return "tiled", int(tm), int(tn), limit


def _layernorm(x_ref, gamma_ref, beta_ref, d_true):
    """f32 LayerNorm over the last axis of a row tile (padded lanes are zero)."""
    x = x_ref[...].astype(jnp.float32)
    inv_d = 1.0 / d_true
    mean = jnp.sum(x, axis=-1, keepdims=True) * inv_d
    if d_true == x.shape[-1]:
        centered = x - mean
        var = jnp.sum(centered * centered, axis=-1, keepdims=True) * inv_d
        xn = centered * jax.lax.rsqrt(var + EPS)
    else:
        # Padded lanes of x are zero, so sums over the padded width are sums
        # over the true D; E[x^2] - mean^2 needs no lane mask.  Zero-padded
        # gamma zeroes the padded lanes of xn below.
        var = jnp.sum(x * x, axis=-1, keepdims=True) * inv_d - mean * mean
        xn = (x - mean) * jax.lax.rsqrt(jnp.maximum(var, 0.0) + EPS)
    xn = xn * gamma_ref[...].astype(jnp.float32) + beta_ref[...].astype(jnp.float32)
    # Cast back so the MXU sees the input dtype (bf16 stays bf16), f32 accum.
    return xn.astype(x_ref.dtype)


def _prenorm_resident_kernel(x_ref, gamma_ref, beta_ref, w_ref, b_ref, o_ref,
                             *, d_true):
    """Fused LayerNorm + Linear with the full (Dp, Dp) weight resident in VMEM."""
    xn = _layernorm(x_ref, gamma_ref, beta_ref, d_true)
    y = jnp.dot(xn, w_ref[...], preferred_element_type=jnp.float32)
    o_ref[...] = (y + b_ref[...].astype(jnp.float32)).astype(o_ref.dtype)


def _prenorm_tiled_kernel(x_ref, gamma_ref, beta_ref, w_ref, b_ref, o_ref,
                          xn_ref, *, d_true):
    """Large-D variant: LayerNorm computed once per row tile, cached in VMEM,
    reused across streaming (Dp, tn) weight tiles."""
    @pl.when(pl.program_id(1) == 0)
    def _():
        xn_ref[...] = _layernorm(x_ref, gamma_ref, beta_ref, d_true)

    y = jnp.dot(xn_ref[...], w_ref[...], preferred_element_type=jnp.float32)
    o_ref[...] = (y + b_ref[...].astype(jnp.float32)).astype(o_ref.dtype)


@functools.partial(jax.jit, static_argnames=("block_rows",))
def prenorm(x, gamma, beta, w, b, *, block_rows=None):
    """x: [B, S, D] -> fn(LayerNorm(x)) with fn = Linear(D, D)."""
    B, S, D = x.shape
    rows = B * S
    itemsize = jnp.dtype(x.dtype).itemsize

    # Lane-dense feature dim.  If D is already 128-aligned keep it unchanged
    # (avoids a host-side padded copy of x, the dominant HBM cost when
    # mem-bound); otherwise pad to a multiple of 256 so K/N are 256-aligned
    # for the v6e/v7x MXU.
    d_pad = D if D % 128 == 0 else _round_up(D, 256)

    mode, tm, tn, vmem_limit = _plan(rows, d_pad, itemsize)
    if block_rows is not None:
        sub = _sublane(itemsize)
        tm = min(_round_up(max(int(block_rows), 1), sub), _round_up(rows, sub))

    x2 = x.reshape(rows, D)
    if d_pad != D:
        x2 = jnp.zeros((rows, d_pad), x.dtype).at[:, :D].set(x2)
        gamma2 = jnp.zeros((1, d_pad), gamma.dtype).at[0, :D].set(gamma)
        beta2 = jnp.zeros((1, d_pad), beta.dtype).at[0, :D].set(beta)
        w2 = jnp.zeros((d_pad, d_pad), w.dtype).at[:D, :D].set(w)
        b2 = jnp.zeros((1, d_pad), b.dtype).at[0, :D].set(b)
    else:
        gamma2 = gamma.reshape(1, D)
        beta2 = beta.reshape(1, D)
        w2 = w
        b2 = b.reshape(1, D)

    row_tiles = pl.cdiv(rows, tm)  # partial last row tile handled by Pallas

    if mode == "resident":
        grid = (row_tiles,)
        in_specs = [
            pl.BlockSpec((tm, d_pad), lambda i: (i, 0)),      # x row tile
            pl.BlockSpec((1, d_pad), lambda i: (0, 0)),       # gamma
            pl.BlockSpec((1, d_pad), lambda i: (0, 0)),       # beta
            pl.BlockSpec((d_pad, d_pad), lambda i: (0, 0)),   # W (resident)
            pl.BlockSpec((1, d_pad), lambda i: (0, 0)),       # bias
        ]
        out_specs = pl.BlockSpec((tm, d_pad), lambda i: (i, 0))
        scratch_shapes = []
        kernel = functools.partial(_prenorm_resident_kernel, d_true=D)
        # Row tiles are fully independent -> shardable across v7x's 2 TCs.
        dims = ("parallel",)
    else:
        grid = (row_tiles, d_pad // tn)
        in_specs = [
            pl.BlockSpec((tm, d_pad), lambda i, j: (i, 0)),   # x row tile
            pl.BlockSpec((1, d_pad), lambda i, j: (0, 0)),    # gamma
            pl.BlockSpec((1, d_pad), lambda i, j: (0, 0)),    # beta
            pl.BlockSpec((d_pad, tn), lambda i, j: (0, j)),   # W N-tile streams
            pl.BlockSpec((1, tn), lambda i, j: (0, j)),       # bias N-tile
        ]
        out_specs = pl.BlockSpec((tm, tn), lambda i, j: (i, j))
        scratch_shapes = [pltpu.VMEM((tm, d_pad), x.dtype)]   # cached LN output
        kernel = functools.partial(_prenorm_tiled_kernel, d_true=D)
        # N axis carries the xn cache -> must stay sequential.
        dims = ("parallel", "arbitrary")

    out2 = pl.pallas_call(
        kernel,
        out_shape=jax.ShapeDtypeStruct((rows, d_pad), x.dtype),
        grid_spec=pltpu.PrefetchScalarGridSpec(
            num_scalar_prefetch=0,
            grid=grid,
            in_specs=in_specs,
            out_specs=out_specs,
            scratch_shapes=scratch_shapes,
        ),
        compiler_params=_CompilerParams(
            dimension_semantics=dims,
            vmem_limit_bytes=int(vmem_limit),
        ),
    )(x2, gamma2, beta2, w2, b2)

    if d_pad != D:
        out2 = out2[:, :D]
    return out2.reshape(B, S, D)


def _reference(x, gamma, beta, w, b):
    xf = x.astype(jnp.float32)
    mean = jnp.mean(xf, axis=-1, keepdims=True)
    var = jnp.mean((xf - mean) ** 2, axis=-1, keepdims=True)
    xn = (xf - mean) / jnp.sqrt(var + EPS)
    xn = xn * gamma + beta
    return (xn @ w.astype(jnp.float32) + b).astype(x.dtype)


if __name__ == "__main__":
    key = jax.random.PRNGKey(0)
    B, S, D = 2, 8, 32  # small demo shapes: batch=2, seq=8, hidden=32

    k_x, k_w, k_b = jax.random.split(key, 3)
    x = jax.random.normal(k_x, (B, S, D), dtype=jnp.float32)

    # LayerNorm params: PyTorch defaults (weight=1, bias=0).
    gamma = jnp.ones((D,), dtype=jnp.float32)
    beta = jnp.zeros((D,), dtype=jnp.float32)

    # fn = Linear(D, D), deterministic init ~ U(-1/sqrt(D), 1/sqrt(D)).
    bound = 1.0 / (D ** 0.5)
    w = jax.random.uniform(k_w, (D, D), minval=-bound, maxval=bound,
                           dtype=jnp.float32)
    b = jax.random.uniform(k_b, (D,), minval=-bound, maxval=bound,
                           dtype=jnp.float32)

    out = prenorm(x, gamma, beta, w, b)
    jax.block_until_ready(out)

    ref = _reference(x, gamma, beta, w, b)
    assert out.shape == (B, S, D)
    assert jnp.allclose(out, ref, atol=1e-4, rtol=1e-4)

    # TODO(synk): `fn` is an arbitrary wrapped module in the original PreNorm;
    # it is fixed to a Linear(dim, dim) here since no specific fn is supplied.
    print("KERNEL_OK")
</pallas_src>

<mosaic_0001>
module attributes {stable_mosaic.version = 11 : i64} {
  func.func @_prenorm_resident_kernel(%arg0: i32, %arg1: memref<16x256xf32, #tpu.memory_space<vmem>>, %arg2: memref<1x256xf32, #tpu.memory_space<vmem>>, %arg3: memref<1x256xf32, #tpu.memory_space<vmem>>, %arg4: memref<256x256xf32, #tpu.memory_space<vmem>>, %arg5: memref<1x256xf32, #tpu.memory_space<vmem>>, %arg6: memref<16x256xf32, #tpu.memory_space<vmem>>) attributes {dimension_semantics = [#tpu.dimension_semantics<parallel>], iteration_bounds = array<i64: 1>, scalar_prefetch = 0 : i64, scratch_operands = 0 : i64, tpu.core_type = #tpu.core_type<tc>, window_params = [{transform_indices = @transform_0, window_bounds = array<i64: 16, 256>}, {pipeline_mode = #tpu.pipeline_mode<synchronous>, transform_indices = @transform_1, window_bounds = array<i64: 1, 256>}, {pipeline_mode = #tpu.pipeline_mode<synchronous>, transform_indices = @transform_2, window_bounds = array<i64: 1, 256>}, {pipeline_mode = #tpu.pipeline_mode<synchronous>, transform_indices = @transform_3, window_bounds = array<i64: 256, 256>}, {pipeline_mode = #tpu.pipeline_mode<synchronous>, transform_indices = @transform_4, window_bounds = array<i64: 1, 256>}, {transform_indices = @transform_5, window_bounds = array<i64: 16, 256>}]} {
    %c0 = arith.constant 0 : index
    %c0_0 = arith.constant 0 : index
    %0 = vector.load %arg1[%c0, %c0_0] : memref<16x256xf32, #tpu.memory_space<vmem>>, vector<16x256xf32>
    %cst = arith.constant dense<0.000000e+00> : vector<16xf32>
    %1 = vector.multi_reduction <add>, %0, %cst [1] : vector<16x256xf32> to vector<16xf32>
    %2 = vector.shape_cast %1 : vector<16xf32> to vector<16x1xf32>
    %cst_1 = arith.constant 3.125000e-02 : f32
    %3 = vector.broadcast %cst_1 : f32 to vector<16x1xf32>
    %4 = arith.mulf %2, %3 : vector<16x1xf32>
    %5 = arith.mulf %0, %0 : vector<16x256xf32>
    %cst_2 = arith.constant dense<0.000000e+00> : vector<16xf32>
    %6 = vector.multi_reduction <add>, %5, %cst_2 [1] : vector<16x256xf32> to vector<16xf32>
    %7 = vector.shape_cast %6 : vector<16xf32> to vector<16x1xf32>
    %cst_3 = arith.constant 3.125000e-02 : f32
    %8 = vector.broadcast %cst_3 : f32 to vector<16x1xf32>
    %9 = arith.mulf %7, %8 : vector<16x1xf32>
    %10 = arith.mulf %4, %4 : vector<16x1xf32>
    %11 = arith.subf %9, %10 : vector<16x1xf32>
    %12 = vector.broadcast %4 : vector<16x1xf32> to vector<16x256xf32>
    %13 = arith.subf %0, %12 : vector<16x256xf32>
    %cst_4 = arith.constant 0.000000e+00 : f32
    %14 = vector.broadcast %cst_4 : f32 to vector<16x1xf32>
    %15 = arith.maximumf %11, %14 : vector<16x1xf32>
    %cst_5 = arith.constant 9.99999974E-6 : f32
    %16 = vector.broadcast %cst_5 : f32 to vector<16x1xf32>
    %17 = arith.addf %15, %16 : vector<16x1xf32>
    %18 = math.rsqrt %17 : vector<16x1xf32>
    %19 = vector.broadcast %18 : vector<16x1xf32> to vector<16x256xf32>
    %20 = arith.mulf %13, %19 : vector<16x256xf32>
    %c0_6 = arith.constant 0 : index
    %c0_7 = arith.constant 0 : index
    %21 = vector.load %arg2[%c0_6, %c0_7] : memref<1x256xf32, #tpu.memory_space<vmem>>, vector<1x256xf32>
    %22 = vector.broadcast %21 : vector<1x256xf32> to vector<16x256xf32>
    %23 = arith.mulf %20, %22 : vector<16x256xf32>
    %c0_8 = arith.constant 0 : index
    %c0_9 = arith.constant 0 : index
    %24 = vector.load %arg3[%c0_8, %c0_9] : memref<1x256xf32, #tpu.memory_space<vmem>>, vector<1x256xf32>
    %25 = vector.broadcast %24 : vector<1x256xf32> to vector<16x256xf32>
    %26 = arith.addf %23, %25 : vector<16x256xf32>
    %c0_10 = arith.constant 0 : index
    %c0_11 = arith.constant 0 : index
    %27 = vector.load %arg4[%c0_10, %c0_11] : memref<256x256xf32, #tpu.memory_space<vmem>>, vector<256x256xf32>
    %cst_12 = arith.constant dense<0.000000e+00> : vector<16x256xf32>
    %28 = tpu.matmul %26, %27, %cst_12 {dimension_numbers = #tpu.dot_dimension_numbers<[1], [0], [0], [1], [0, 0, 1, 1], [], []>} : vector<16x256xf32>, vector<256x256xf32>, vector<16x256xf32> -> vector<16x256xf32>
    %c0_13 = arith.constant 0 : index
    %c0_14 = arith.constant 0 : index
    %29 = vector.load %arg5[%c0_13, %c0_14] : memref<1x256xf32, #tpu.memory_space<vmem>>, vector<1x256xf32>
    %30 = vector.broadcast %29 : vector<1x256xf32> to vector<16x256xf32>
    %31 = arith.addf %28, %30 : vector<16x256xf32>
    %c0_15 = arith.constant 0 : index
    %c0_16 = arith.constant 0 : index
    %32 = vector.load %arg6[%c0_15, %c0_16] : memref<16x256xf32, #tpu.memory_space<vmem>>, vector<16x256xf32>
    tpu.vector_store %arg6[%c0_15, %c0_16], %31 {strides = array<i32>} : memref<16x256xf32, #tpu.memory_space<vmem>>, vector<16x256xf32>,
    return
  }
  func.func @transform_0(%arg0: i32) -> (i32, i32) {
    %c0_i32 = arith.constant 0 : i32
    %c0_i32_0 = arith.constant 0 : i32
    return %arg0, %c0_i32 : i32, i32
  }
  func.func @transform_1(%arg0: i32) -> (i32, i32) {
    %c0_i32 = arith.constant 0 : i32
    %c0_i32_0 = arith.constant 0 : i32
    %c0_i32_1 = arith.constant 0 : i32
    return %c0_i32, %c0_i32_0 : i32, i32
  }
  func.func @transform_2(%arg0: i32) -> (i32, i32) {
    %c0_i32 = arith.constant 0 : i32
    %c0_i32_0 = arith.constant 0 : i32
    %c0_i32_1 = arith.constant 0 : i32
    return %c0_i32, %c0_i32_0 : i32, i32
  }
  func.func @transform_3(%arg0: i32) -> (i32, i32) {
    %c0_i32 = arith.constant 0 : i32
    %c0_i32_0 = arith.constant 0 : i32
    %c0_i32_1 = arith.constant 0 : i32
    return %c0_i32, %c0_i32_0 : i32, i32
  }
  func.func @transform_4(%arg0: i32) -> (i32, i32) {
    %c0_i32 = arith.constant 0 : i32
    %c0_i32_0 = arith.constant 0 : i32
    %c0_i32_1 = arith.constant 0 : i32
    return %c0_i32, %c0_i32_0 : i32, i32
  }
  func.func @transform_5(%arg0: i32) -> (i32, i32) {
    %c0_i32 = arith.constant 0 : i32
    %c0_i32_0 = arith.constant 0 : i32
    return %arg0, %c0_i32 : i32, i32
  }
}

</mosaic_0001>

<bundles_post_ra>
// kernel: prenorm.1
= control target key start
LH: loop header
LB: loop body
LE: loop exit
PB: predicated region body
PF: predicated region fallthrough
CT: control target
= control target key end

     0   :  { %s634_s0 = inlined_call_operand.vmem [shape: f32[16,256], index: 0, kind: input, shape index: {}]   ;;  %s635_s3 = inlined_call_operand.vmem [shape: f32[256,256], index: 3, kind: input, shape index: {}]   ;;  %s636_s1 = inlined_call_operand.vmem [shape: f32[1,256], index: 1, kind: input, shape index: {}]   ;;  %s637_s2 = inlined_call_operand.vmem [shape: f32[1,256], index: 2, kind: input, shape index: {}]   ;;  %s638_s4 = inlined_call_operand.vmem [shape: f32[1,256], index: 4, kind: input, shape index: {}]   ;;  %s639_s5 = inlined_call_operand.vmem [shape: f32[16,256], index: 5, kind: output, shape index: {}]  }
   0x1   :  { %v388_v0 = vld [vmem:[%s634_s0] sm:$0xff]  ;;  %v393_v1 = vld [vmem:[%s634_s0 + $0x8] sm:$0xff]  ;;  %v398_v2 = vld [vmem:[%s634_s0 + $0x10] sm:$0xff] }
   0x2   :  { %v24_v3 = vadd.f32 %v393_v1, %v388_v0  ;;  %v32_v4 = vmul.f32 %v388_v0, %v388_v0  ;;  %v33_v5 = vmul.f32 %v393_v1, %v393_v1  ;;  %v409_v6 = vld [vmem:[%s634_s0 + $0x18] sm:$0xff]  ;;  %v34_v7 = vmul.f32 %v398_v2, %v398_v2  ;;  %v95_v8 = vld [vmem:[%s635_s3 + $0x8] sm:$0xff]  ;;  %v94_v12 = vld [vmem:[%s635_s3] sm:$0xff] }
   0x3   :  { %v97_v9 = vld [vmem:[%s635_s3 + $0x18] sm:$0xff]  ;;  %v35_v10 = vmul.f32 %v409_v6, %v409_v6  ;;  %v96_v13 = vld [vmem:[%s635_s3 + $0x10] sm:$0xff]  ;;  %v99_v14 = vld [vmem:[%s635_s3 + $0x28] sm:$0xff]  ;;  %v27_v16 = vadd.f32 %v409_v6, %v398_v2 }
   0x4   :  { %v255_v11 = vpack.c.bf16 %v97_v9, %v95_v8  ;;  %25 = vadd.xlane.f32.xlu0 %v24_v3  ;;  %v36_v15 = vadd.f32 %v33_v5, %v32_v4  ;;  %v257_v17 = vpack.c.bf16 %v96_v13, %v94_v12  ;;  %v101_v18 = vld [vmem:[%s635_s3 + $0x38] sm:$0xff]  ;;  %v98_v19 = vld [vmem:[%s635_s3 + $0x20] sm:$0xff]  ;;  %v100_v20 = vld [vmem:[%s635_s3 + $0x30] sm:$0xff] }
   0x5   :  { %v259_v21 = vpack.c.bf16 %v101_v18, %v99_v14  ;;  %v103_v22 = vld [vmem:[%s635_s3 + $0x48] sm:$0xff]  ;;  %v105_v23 = vld [vmem:[%s635_s3 + $0x58] sm:$0xff]  ;;  %v39_v24 = vadd.f32 %v35_v10, %v34_v7  ;;  %v261_v25 = vpack.c.bf16 %v100_v20, %v98_v19  ;;  %v102_v27 = vld [vmem:[%s635_s3 + $0x40] sm:$0xff] }
   0x6   :  { %256 = vmatprep.subr.bf16.mxu0 %v255_v11  ;;  %319 = vmatprep.subr.bf16.mxu1 %v255_v11  ;;  %v263_v26 = vpack.c.bf16 %v105_v23, %v103_v22  ;;  %v104_v28 = vld [vmem:[%s635_s3 + $0x50] sm:$0xff]  ;;  %v107_v29 = vld [vmem:[%s635_s3 + $0x68] sm:$0xff]  ;;  %v109_v30 = vld [vmem:[%s635_s3 + $0x78] sm:$0xff] }
   0x7   :  { %37 = vadd.xlane.f32.xlu1 %v36_v15  ;;  %258 = vmatpush1.bf16.msra.mxu0 %v257_v17  ;;  %v265_v31 = vpack.c.bf16 %v104_v28, %v102_v27  ;;  %v267_v32 = vpack.c.bf16 %v109_v30, %v107_v29  ;;  %v106_v33 = vld [vmem:[%s635_s3 + $0x60] sm:$0xff]  ;;  %v108_v34 = vld [vmem:[%s635_s3 + $0x70] sm:$0xff]  ;;  %v111_v35 = vld [vmem:[%s635_s3 + $0x88] sm:$0xff] }
   0x8   :  { %260 = vmatprep.subr.bf16.mxu0 %v259_v21  ;;  %335 = vmatpush1.bf16.msra.mxu1 %v257_v17  ;;  %v113_v36 = vld [vmem:[%s635_s3 + $0x98] sm:$0xff]  ;;  %v269_v37 = vpack.c.bf16 %v108_v34, %v106_v33  ;;  %v110_v39 = vld [vmem:[%s635_s3 + $0x80] sm:$0xff]  ;;  %v112_v40 = vld [vmem:[%s635_s3 + $0x90] sm:$0xff] }
   0x9   :  { %28 = vadd.xlane.f32.xlu0 %v27_v16  ;;  %320 = vmatprep.subr.bf16.mxu1 %v259_v21  ;;  %v271_v38 = vpack.c.bf16 %v113_v36, %v111_v35  ;;  %v115_v41 = vld [vmem:[%s635_s3 + $0xa8] sm:$0xff]  ;;  %v117_v42 = vld [vmem:[%s635_s3 + $0xb8] sm:$0xff]  ;;  %v273_v43 = vpack.c.bf16 %v112_v40, %v110_v39  ;;  %v114_v45 = vld [vmem:[%s635_s3 + $0xa0] sm:$0xff] }
   0xa   :  { %v275_v44 = vpack.c.bf16 %v117_v42, %v115_v41  ;;  %v116_v46 = vld [vmem:[%s635_s3 + $0xb0] sm:$0xff]  ;;  %v119_v47 = vld [vmem:[%s635_s3 + $0xc8] sm:$0xff]  ;;  %v121_v48 = vld [vmem:[%s635_s3 + $0xd8] sm:$0xff] }
   0xb   :  { %40 = vadd.xlane.f32.xlu1 %v39_v24  ;;  %262 = vmatpush1.bf16.msra.mxu0 %v261_v25  ;;  %v277_v49 = vpack.c.bf16 %v116_v46, %v114_v45  ;;  %v279_v50 = vpack.c.bf16 %v121_v48, %v119_v47  ;;  %v118_v51 = vld [vmem:[%s635_s3 + $0xc0] sm:$0xff]  ;;  %v120_v52 = vld [vmem:[%s635_s3 + $0xd0] sm:$0xff]  ;;  %v123_v53 = vld [vmem:[%s635_s3 + $0xe8] sm:$0xff] }
   0xc   :  { %264 = vmatprep.subr.bf16.mxu0 %v263_v26  ;;  %336 = vmatpush1.bf16.msra.mxu1 %v261_v25  ;;  %v125_v54 = vld [vmem:[%s635_s3 + $0xf8] sm:$0xff]  ;;  %v281_v55 = vpack.c.bf16 %v120_v52, %v118_v51  ;;  %v122_v57 = vld [vmem:[%s635_s3 + $0xe0] sm:$0xff]  ;;  %v124_v58 = vld [vmem:[%s635_s3 + $0xf0] sm:$0xff] }
   0xd   :  { %321 = vmatprep.subr.bf16.mxu1 %v263_v26  ;;  %v283_v56 = vpack.c.bf16 %v125_v54, %v123_v53  ;;  %v127_v59 = vld [vmem:[%s635_s3 + $0x108] sm:$0xff]  ;;  %v129_v60 = vld [vmem:[%s635_s3 + $0x118] sm:$0xff]  ;;  %v285_v61 = vpack.c.bf16 %v124_v58, %v122_v57  ;;  %v126_v63 = vld [vmem:[%s635_s3 + $0x100] sm:$0xff] }
   0xe   :  { %v287_v62 = vpack.c.bf16 %v129_v60, %v127_v59  ;;  %v128_v3 = vld [vmem:[%s635_s3 + $0x110] sm:$0xff]  ;;  %v131_v4 = vld [vmem:[%s635_s3 + $0x128] sm:$0xff]  ;;  %v133_v5 = vld [vmem:[%s635_s3 + $0x138] sm:$0xff]  ;;  %v64_v60 = vlaneseq }
   0xf   :  { %266 = vmatpush1.bf16.msra.mxu0 %v265_v31  ;;  %v289_v7 = vpack.c.bf16 %v128_v3, %v126_v63  ;;  %v291_v8 = vpack.c.bf16 %v133_v5, %v131_v4  ;;  %v130_v9 = vld [vmem:[%s635_s3 + $0x120] sm:$0xff]  ;;  %v132_v10 = vld [vmem:[%s635_s3 + $0x130] sm:$0xff]  ;;  %v135_v11 = vld [vmem:[%s635_s3 + $0x148] sm:$0xff] }
  0x10   :  { %268 = vmatprep.subr.bf16.mxu0 %v267_v32  ;;  %337 = vmatpush1.bf16.msra.mxu1 %v265_v31  ;;  %v137_v12 = vld [vmem:[%s635_s3 + $0x158] sm:$0xff]  ;;  %v293_v13 = vpack.c.bf16 %v132_v10, %v130_v9  ;;  %v134_v15 = vld [vmem:[%s635_s3 + $0x140] sm:$0xff]  ;;  %v136_v16 = vld [vmem:[%s635_s3 + $0x150] sm:$0xff]  ;;  %v65_v3 = vshrl.u32 %v64_v60, 7 }
  0x11   :  { %322 = vmatprep.subr.bf16.mxu1 %v267_v32  ;;  %v295_v14 = vpack.c.bf16 %v137_v12, %v135_v11  ;;  %v139_v17 = vld [vmem:[%s635_s3 + $0x168] sm:$0xff]  ;;  %v141_v18 = vld [vmem:[%s635_s3 + $0x178] sm:$0xff]  ;;  %v297_v19 = vpack.c.bf16 %v136_v16, %v134_v15  ;;  %v138_v21 = vld [vmem:[%s635_s3 + $0x160] sm:$0xff] }
  0x12   :  { %v299_v20 = vpack.c.bf16 %v141_v18, %v139_v17  ;;  %v140_v22 = vld [vmem:[%s635_s3 + $0x170] sm:$0xff]  ;;  %v143_v23 = vld [vmem:[%s635_s3 + $0x188] sm:$0xff]  ;;  %v145_v24 = vld [vmem:[%s635_s3 + $0x198] sm:$0xff]  ;;  %v66_v5 = vsub.s32 0, %v65_v3 }
  0x13   :  { %270 = vmatpush1.bf16.msra.mxu0 %v269_v37  ;;  %v301_v25 = vpack.c.bf16 %v140_v22, %v138_v21  ;;  %v303_v26 = vpack.c.bf16 %v145_v24, %v143_v23  ;;  %v142_v27 = vld [vmem:[%s635_s3 + $0x180] sm:$0xff]  ;;  %v144_v28 = vld [vmem:[%s635_s3 + $0x190] sm:$0xff]  ;;  %v147_v29 = vld [vmem:[%s635_s3 + $0x1a8] sm:$0xff] }
  0x14   :  { %272 = vmatprep.subr.bf16.mxu0 %v271_v38  ;;  %338 = vmatpush1.bf16.msra.mxu1 %v269_v37  ;;  %v149_v30 = vld [vmem:[%s635_s3 + $0x1b8] sm:$0xff]  ;;  %v305_v31 = vpack.c.bf16 %v144_v28, %v142_v27  ;;  %v146_v33 = vld [vmem:[%s635_s3 + $0x1a0] sm:$0xff]  ;;  %v148_v34 = vld [vmem:[%s635_s3 + $0x1b0] sm:$0xff] }
  0x15   :  { %323 = vmatprep.subr.bf16.mxu1 %v271_v38  ;;  %v307_v32 = vpack.c.bf16 %v149_v30, %v147_v29  ;;  %v151_v35 = vld [vmem:[%s635_s3 + $0x1c8] sm:$0xff]  ;;  %v153_v36 = vld [vmem:[%s635_s3 + $0x1d8] sm:$0xff]  ;;  %v309_v37 = vpack.c.bf16 %v148_v34, %v146_v33  ;;  %v150_v39 = vld [vmem:[%s635_s3 + $0x1c0] sm:$0xff] }
  0x16   :  { %v311_v38 = vpack.c.bf16 %v153_v36, %v151_v35  ;;  %v152_v40 = vld [vmem:[%s635_s3 + $0x1d0] sm:$0xff]  ;;  %v155_v41 = vld [vmem:[%s635_s3 + $0x1e8] sm:$0xff]  ;;  %v157_v42 = vld [vmem:[%s635_s3 + $0x1f8] sm:$0xff] }
  0x17   :  { %274 = vmatpush1.bf16.msra.mxu0 %v273_v43  ;;  %v154_v45 = vld [vmem:[%s635_s3 + $0x1e0] sm:$0xff]  ;;  %v156_v46 = vld [vmem:[%s635_s3 + $0x1f0] sm:$0xff] }
  0x18   :  { %276 = vmatprep.subr.bf16.mxu0 %v275_v44  ;;  %339 = vmatpush1.bf16.msra.mxu1 %v273_v43  ;;  %v313_v43 = vpack.c.bf16 %v152_v40, %v150_v39  ;;  %v317_v47 = vpack.c.bf16 %v156_v46, %v154_v45  ;;  %v78_v9 = vld [vmem:[%s637_s2] sm:$0x3] }
  0x19   :  { %324 = vmatprep.subr.bf16.mxu1 %v275_v44  ;;  %v315_v44 = vpack.c.bf16 %v157_v42, %v155_v41  ;;  %v83_v16 = vrot.slane %v78_v9, %v66_v5  ;;  %v158_v30 = vld [vmem:[%s638_s4] sm:$0x3] }
  0x1b   :  { %278 = vmatpush1.bf16.msra.mxu0 %v277_v49 }
  0x1c   :  { %280 = vmatprep.subr.bf16.mxu0 %v279_v50  ;;  %340 = vmatpush1.bf16.msra.mxu1 %v277_v49 }
  0x1d   :  { %325 = vmatprep.subr.bf16.mxu1 %v279_v50 }
  0x1f   :  { %282 = vmatpush1.bf16.msra.mxu0 %v281_v55 }
  0x20   :  { %284 = vmatprep.subr.bf16.mxu0 %v283_v56  ;;  %341 = vmatpush1.bf16.msra.mxu1 %v281_v55 }
  0x21   :  { %326 = vmatprep.subr.bf16.mxu1 %v283_v56 }
  0x23   :  { %286 = vmatpush1.bf16.msra.mxu0 %v285_v61 }
  0x24   :  { %288 = vmatprep.subr.bf16.mxu0 %v287_v62  ;;  %342 = vmatpush1.bf16.msra.mxu1 %v285_v61 }
  0x25   :  { %327 = vmatprep.subr.bf16.mxu1 %v287_v62 }
  0x27   :  { %290 = vmatpush1.bf16.msra.mxu0 %v289_v7 }
  0x28   :  { %292 = vmatprep.subr.bf16.mxu0 %v291_v8  ;;  %343 = vmatpush1.bf16.msra.mxu1 %v289_v7  ;;  %v70_v7 = vsub.s32 1, %v65_v3 }
  0x29   :  { %328 = vmatprep.subr.bf16.mxu1 %v291_v8  ;;  %v62_v8 = vld [vmem:[%s636_s1] sm:$0x3] }
  0x2a   :  { %v67_v12 = vrot.slane %v62_v8, %v66_v5  ;;  %v87_v17 = vrot.slane %v78_v9, %v70_v7 }
  0x2b   :  { %294 = vmatpush1.bf16.msra.mxu0 %v293_v13 }
  0x2c   :  { %296 = vmatprep.subr.bf16.mxu0 %v295_v14  ;;  %344 = vmatpush1.bf16.msra.mxu1 %v293_v13  ;;  %v71_v13 = vrot.slane %v62_v8, %v70_v7 }
  0x2d   :  { %329 = vmatprep.subr.bf16.mxu1 %v295_v14 }
  0x2f   :  { %298 = vmatpush1.bf16.msra.mxu0 %v297_v19 }
  0x30   :  { %300 = vmatprep.subr.bf16.mxu0 %v299_v20  ;;  %345 = vmatpush1.bf16.msra.mxu1 %v297_v19 }
  0x31   :  { %330 = vmatprep.subr.bf16.mxu1 %v299_v20 }
  0x33   :  { %302 = vmatpush1.bf16.msra.mxu0 %v301_v25 }
  0x34   :  { %304 = vmatprep.subr.bf16.mxu0 %v303_v26  ;;  %346 = vmatpush1.bf16.msra.mxu1 %v301_v25 }
  0x35   :  { %331 = vmatprep.subr.bf16.mxu1 %v303_v26 }
  0x37   :  { %306 = vmatpush1.bf16.msra.mxu0 %v305_v31 }
  0x38   :  { %308 = vmatprep.subr.bf16.mxu0 %v307_v32  ;;  %347 = vmatpush1.bf16.msra.mxu1 %v305_v31  ;;  %v167_v31 = vrot.slane %v158_v30, %v70_v7 }
  0x39   :  { %332 = vmatprep.subr.bf16.mxu1 %v307_v32 }
  0x3b   :  { %310 = vmatpush1.bf16.msra.mxu0 %v309_v37 }
  0x3c   :  { %312 = vmatprep.subr.bf16.mxu0 %v311_v38  ;;  %348 = vmatpush1.bf16.msra.mxu1 %v309_v37 }
  0x3d   :  { %333 = vmatprep.subr.bf16.mxu1 %v311_v38 }
  0x3f   :  { %314 = vmatpush1.bf16.msra.mxu0 %v313_v43 }
  0x40   :  { %316 = vmatprep.subr.bf16.mxu0 %v315_v44  ;;  %349 = vmatpush1.bf16.msra.mxu1 %v313_v43 }
  0x41   :  { %334 = vmatprep.subr.bf16.mxu1 %v315_v44 }
  0x43   :  { %318 = vmatpush1.bf16.msra.mxu0 %v317_v47 }
  0x44   :  { %350 = vmatpush1.bf16.msra.mxu1 %v317_v47 }
  0x91   :  { %v26_v48 = vpop.xlane.xlu0 %25 }
  0x92   :  { %v30_v49 = vmul.f32 0.03125, %v26_v48 }
  0x94   :  { %v38_v50 = vpop.xlane.xlu1 %37  ;;  %v44_v52 = vmul.f32 %v30_v49, %v30_v49  ;;  %v48_v10 = vsub.f32 %v388_v0, %v30_v49  ;;  %v49_v11 = vsub.f32 %v393_v1, %v30_v49 }
  0x95   :  { %v42_v51 = vmul.f32 0.03125, %v38_v50 }
  0x96   :  { %v29_v53 = vpop.xlane.xlu0 %28 }
  0x97   :  { %v46_v54 = vsub.f32 %v42_v51, %v44_v52  ;;  %v31_v55 = vmul.f32 0.03125, %v29_v53 }
  0x98   :  { %v41_v56 = vpop.xlane.xlu1 %40 }
  0x99   :  { %v52_v57 = vmax.f32 %v46_v54, 0.0  ;;  %v43_v58 = vmul.f32 0.03125, %v41_v56  ;;  %v45_v59 = vmul.f32 %v31_v55, %v31_v55  ;;  %v50_v21 = vsub.f32 %v398_v2, %v31_v55 }
  0x9a   :  { %v51_v22 = vsub.f32 %v409_v6, %v31_v55  ;;  %v163_v2 = vrot.slane %v158_v30, %v66_v5 }
  0x9b   :  { %v54_v61 = vadd.f32 1e-05, %v52_v57  ;;  %v47_v62 = vsub.f32 %v43_v58, %v45_v59 }
  0x9d   :  { %351 = vrsqrt.f32 %v54_v61  ;;  %v53_v63 = vmax.f32 %v47_v62, 0.0 }
  0x9f   :  { %v55_v4 = vadd.f32 1e-05, %v53_v63 }
  0xa1   :  { %353 = vrsqrt.f32 %v55_v4 }
  0xa7   :  { %v352_v14 = vpop.eup %351 }
  0xa8   :  { %v59_v15 = vmul.f32 %v352_v14, %v49_v11  ;;  %v58_v18 = vmul.f32 %v352_v14, %v48_v10 }
  0xaa   :  { %v75_v19 = vmul.f32 %v71_v13, %v59_v15  ;;  %v74_v20 = vmul.f32 %v67_v12, %v58_v18 }
  0xab   :  { %v354_v23 = vpop.eup %353 }
  0xac   :  { %v91_v24 = vadd.f32 %v87_v17, %v75_v19  ;;  %v90_v25 = vadd.f32 %v83_v16, %v74_v20  ;;  %v61_v26 = vmul.f32 %v354_v23, %v51_v22  ;;  %v60_v0 = vmul.f32 %v354_v23, %v50_v21 }
  0xae   :  { %234 = vmatprep.mubr.f32.mxu0 %v91_v24  ;;  %v77_v1 = vmul.f32 %v71_v13, %v61_v26  ;;  %v76_v27 = vmul.f32 %v67_v12, %v60_v0 }
  0xaf   :  { %235 = vmatmul.mubr.f32.vlgmr.msra.gmra.mrb[0].mxu0 %v90_v25 }
  0xb0   :  { %v93_v28 = vadd.f32 %v87_v17, %v77_v1  ;;  %v92_v29 = vadd.f32 %v83_v16, %v76_v27 }
  0xb2   :  { %240 = vmatprep.mubr.f32.mxu1 %v93_v28 }
  0xb3   :  { %241 = vmatmul.mubr.f32.vlgmr.msra.gmra.mrb[0].mxu1 %v92_v29 }
 0x182   :  { %v236_v6 = vpop.f32.mrb[0].mxu0 }
 0x183   :  { %v237_v32 = vadd.f32 %v236_v6, %v163_v2  ;;  %v238_v33 = vpop.f32.mrb[1].mxu0 }
 0x184   :  { %v239_v34 = vadd.f32 %v238_v33, %v167_v31 }
 0x185   :  { %247 = vst [vmem:[%s639_s5] sm:$0xff] %v237_v32 }
 0x186   :  { %248 = vst [vmem:[%s639_s5 + $0x8] sm:$0xff] %v239_v34  ;;  %v242_v35 = vpop.f32.mrb[0].mxu1 }
 0x187   :  { %v243_v36 = vadd.f32 %v242_v35, %v163_v2  ;;  %v244_v37 = vpop.f32.mrb[1].mxu1 }
 0x188   :  { %v245_v38 = vadd.f32 %v244_v37, %v167_v31 }
 0x189   :  { %249 = vst [vmem:[%s639_s5 + $0x10] sm:$0xff] %v243_v36 }
 0x18a   :  { %250 = vst [vmem:[%s639_s5 + $0x18] sm:$0xff] %v245_v38 }

</bundles_post_ra>
